<compile_context>
chip_gen: v7x
topology: tpu7x:2x2x1
jax: 0.10.0
libtpu: 0.0.40
codegen_flags: <defaults>
</compile_context>

<pallas_src>
import jax
import jax.numpy as jnp
from jax import lax
from jax.experimental import pallas as pl
from jax.experimental.pallas import tpu as pltpu


_VMEM_LIMIT = 48 * 1024 * 1024       # explicit cap; headroom under v7x's 64 MiB VMEM
_ROW_TILE_CAP = 8192                 # L-axis tile cap (raised per perf review)
_F_TILE_CAP = 32768                  # flat-hidden reduction tile cap (raised)
_TILE_BYTES_BUDGET = 4 * 1024 * 1024 # single-buffer byte budget per out-layer grid step
_CHUNK = 1024                        # in-kernel lane chunk (bounds vreg pressure)


def _round_up(x, m):
    return ((x + m - 1) // m) * m


def _largest_aligned_divisor(total, cap, align=128):
    """Largest multiple-of-`align` divisor of `total` that is <= cap, or None."""
    start = min(cap, total)
    start -= start % align
    for cand in range(start, 0, -align):
        if total % cand == 0:
            return cand
    return None


def _choose_l_tile(L, bytes_per_lane):
    """Pick (TL, nL) for the out-layer L axis.

    Explicit policy (no silent full-extent fallback):
      * L <= cap                     -> single full block (always legal).
      * aligned divisor of L <= cap  -> exact tiling.
      * otherwise                    -> fixed 128-multiple tile + cdiv grid; the
                                        out-layer is per-column so the ragged
                                        last block cannot corrupt valid columns.
    """
    cap = (_TILE_BYTES_BUDGET // max(bytes_per_lane, 1)) // 128 * 128
    cap = max(128, min(_ROW_TILE_CAP, cap))
    if L <= cap:
        return L, 1
    tl = _largest_aligned_divisor(L, cap)
    if tl is not None:
        return tl, L // tl
    return cap, pl.cdiv(L, cap)


def _chunk_size(tl):
    for ch in (_CHUNK, 512, 256, 128):
        if tl >= ch and tl % ch == 0:
            return ch
    return tl


# ----------------------------------------------------------------------------
# Kernel A: attention "V" kernel.
#   Accumulates q = h_flat @ W_q over F tiles (bf16 x bf16 into the MXU, f32
#   accumulator), then finalizes V = softmax(q @ memory^T) @ memory -> (b, d).
# ----------------------------------------------------------------------------
def hra_attention_v_kernel(h_ref, wqT_ref, mem_ref, v_ref, q_acc):
    f = pl.program_id(0)

    @pl.when(f == 0)
    def _init():
        q_acc[...] = jnp.zeros_like(q_acc)

    # Cast the (small, b-row) h tile to bf16 and contract bf16 x bf16 on the
    # MXU; W_q^T stays bf16 as streamed (no VPU upcast of the big operand).
    h = h_ref[...].astype(jnp.bfloat16)                     # (b, TF)
    wqT = wqT_ref[...]                                      # (d, TF) bf16, lane-dense
    q_acc[...] += lax.dot_general(
        h, wqT, dimension_numbers=(((1,), (1,)), ((), ())),
        preferred_element_type=jnp.float32)                 # (b, d) f32

    @pl.when(f == pl.num_programs(0) - 1)
    def _finalize():
        mem = mem_ref[...]                                  # (M, d) f32, resident
        logits = lax.dot_general(
            q_acc[...], mem, dimension_numbers=(((1,), (1,)), ((), ())),
            preferred_element_type=jnp.float32)             # (b, M)
        logits = logits - jnp.max(logits, axis=-1, keepdims=True)
        p = jnp.exp(logits)
        # Exact reciprocal kept (approx=True perturbs attention weights ~1e-3).
        att = p * pl.reciprocal(jnp.sum(p, axis=-1, keepdims=True))
        v_ref[...] = jnp.dot(att, mem, preferred_element_type=jnp.float32)


# ----------------------------------------------------------------------------
# Kernel B (hra_bool=True): fused out-layer, gridded over (L tiles, batch).
#   Per lane-chunk: rebuild the h_me chunk from V (SMEM) and the matching W_fc
#   chunk, ReLU -> conv1(1x1x1) -> ReLU -> conv2(1x1x1); intermediates stay in
#   vregs, only the output chunk is stored.
# ----------------------------------------------------------------------------
def hra_outlayer_fused_kernel(v_sm, x_ref, wfc_ref, w1a_ref, w1b_ref, b1_ref,
                              w2_ref, b2_ref, o_ref):
    bi = pl.program_id(1)
    d, c, tl = wfc_ref.shape                      # memo_dim, channels, L tile (static)
    ch = _chunk_size(tl)
    n_chunks = tl // ch

    # Loop-invariant small operands, hoisted once per grid step.
    w1a = w1a_ref[...]
    w1b = w1b_ref[...]
    b1 = b1_ref[...]
    w2 = w2_ref[...]
    b2 = b2_ref[...]
    v = [v_sm[bi, j] for j in range(d)]           # d SMEM scalar reads, hoisted

    def chunk_body(k, carry):
        off = k * ch
        if ch % 128 == 0 and not isinstance(off, int):
            off = pl.multiple_of(off, 128)
        x_sc = jnp.maximum(x_ref[0, :, pl.ds(off, ch)], 0.0)            # (c, ch)
        # h_me chunk = sum_j V[bi, j] * W_fc[j, :, chunk]  (stays in vregs)
        hme = v[0] * wfc_ref[0, :, pl.ds(off, ch)].astype(jnp.float32)
        for j in range(1, d):
            hme = hme + v[j] * wfc_ref[j, :, pl.ds(off, ch)].astype(jnp.float32)
        hme = jnp.maximum(hme, 0.0)
        h1 = (jnp.dot(w1a, x_sc, preferred_element_type=jnp.float32)
              + jnp.dot(w1b, hme, preferred_element_type=jnp.float32)
              + b1)                                                     # (c, ch)
        h1 = jnp.maximum(h1, 0.0)
        o_ref[0, :, pl.ds(off, ch)] = (
            jnp.dot(w2, h1, preferred_element_type=jnp.float32) + b2)   # (cout, ch)
        return carry

    if n_chunks == 1:
        chunk_body(0, 0)
    else:
        lax.fori_loop(0, n_chunks, chunk_body, 0, unroll=(n_chunks <= 8))


# ----------------------------------------------------------------------------
# Kernel B' (hra_bool=False): plain out-layer, same grid / layout / chunking.
# ----------------------------------------------------------------------------
def hra_outlayer_kernel(x_ref, w1_ref, b1_ref, w2_ref, b2_ref, o_ref):
    tl = x_ref.shape[2]
    ch = _chunk_size(tl)
    n_chunks = tl // ch
    w1 = w1_ref[...]
    b1 = b1_ref[...]
    w2 = w2_ref[...]
    b2 = b2_ref[...]

    def chunk_body(k, carry):
        off = k * ch
        if ch % 128 == 0 and not isinstance(off, int):
            off = pl.multiple_of(off, 128)
        x = jnp.maximum(x_ref[0, :, pl.ds(off, ch)], 0.0)               # (cin, ch)
        h1 = jnp.maximum(
            jnp.dot(w1, x, preferred_element_type=jnp.float32) + b1, 0.0)
        o_ref[0, :, pl.ds(off, ch)] = (
            jnp.dot(w2, h1, preferred_element_type=jnp.float32) + b2)
        return carry

    if n_chunks == 1:
        chunk_body(0, 0)
    else:
        lax.fori_loop(0, n_chunks, chunk_body, 0, unroll=(n_chunks <= 8))


# ----------------------------------------------------------------------------
# Wrappers
# ----------------------------------------------------------------------------
def _attention_v(h_flat, wq_t, memory):
    """h_flat: (b, Fp) f32 (zero-padded), wq_t: (d, Fp) bf16, memory: (M, d) f32."""
    b, Fp = h_flat.shape
    M, d = memory.shape
    if Fp <= _F_TILE_CAP:
        TF = Fp
    else:
        TF = _largest_aligned_divisor(Fp, _F_TILE_CAP)   # Fp is a 128-multiple
        assert TF is not None
    nF = Fp // TF
    cost = pl.CostEstimate(
        flops=2 * b * Fp * d + 4 * b * M * d,
        transcendentals=b * M,
        bytes_accessed=b * Fp * 4 + Fp * d * 2 + M * d * 4 + b * d * 4)
    return pl.pallas_call(
        hra_attention_v_kernel,
        out_shape=jax.ShapeDtypeStruct((b, d), jnp.float32),
        grid=(nF,),
        in_specs=[
            pl.BlockSpec((b, TF), lambda f: (0, f)),      # h_flat tile
            pl.BlockSpec((d, TF), lambda f: (0, f)),      # W_q^T tile (bf16, lane-dense)
            pl.BlockSpec((M, d), lambda f: (0, 0)),       # memory (resident)
        ],
        out_specs=pl.BlockSpec((b, d), lambda f: (0, 0)),
        scratch_shapes=[pltpu.VMEM((b, d), jnp.float32)],  # q accumulator
        compiler_params=pltpu.CompilerParams(
            dimension_semantics=("arbitrary",),            # F is a reduction axis
            vmem_limit_bytes=_VMEM_LIMIT),
        cost_estimate=cost,
    )(h_flat, wq_t, memory)


def hra_forward(h_sc, params, hra_bool=True):
    """h_sc: (b, c, s, n, t) float32. Returns (b, n_pred*out_dim, s, n, t) float32."""
    b, c, s, n, t = h_sc.shape
    L = s * n * t
    cout = params["w2"].shape[0]
    x3 = h_sc.reshape(b, c, L)                    # channels-first; no transpose
    b1, w2, b2 = params["b1"], params["w2"], params["b2"]
    # v7x megacore: split the L axis across cores (W_fc tiles stay disjoint per
    # core); the tiny batch axis is "arbitrary".
    sem = ("parallel", "arbitrary")

    if hra_bool:
        M, d = params["memory"].shape
        F = c * L
        assert F == params["flat_hidden"], (
            "HRA flatten requires c*s*n*t == flat_hidden "
            "(the PyTorch module's reshape(b, -1) @ W_q implies t == 1)")
        Fp = params["W_qT"].shape[1]              # 128-aligned, zero-padded

        # (A) V = softmax((h @ W_q) @ memory^T) @ memory  -> tiny (b, d)
        h_flat = h_sc.reshape(b, F)
        if Fp != F:
            h_flat = jnp.pad(h_flat, ((0, 0), (0, Fp - F)))   # zeros x zeros = 0
        v = _attention_v(h_flat, params["W_qT"], params["memory"])

        # (B) fused out-layer: h_me reconstructed per tile; channel concat
        #     eliminated by splitting conv1's weight into h_sc / h_me halves.
        #     NOTE: assumes conv1 input-channel order [h_sc, h_me] (matches ref).
        wfc_r = params["W_fc"].reshape(d, c, L)   # free row-major reshape (bf16)
        w1a = params["w1"][:, :c]                 # (c, c)  acts on h_sc channels
        w1b = params["w1"][:, c:]                 # (c, d)  acts on h_me channels
        bytes_per_lane = 2 * d * c + 4 * c + 4 * cout
        TL, nL = _choose_l_tile(L, bytes_per_lane)
        cost = pl.CostEstimate(
            flops=b * L * (2 * d * c + 4 * c * c + 2 * c * cout),
            transcendentals=0,
            bytes_accessed=b * c * L * 4 + d * c * L * 2 + b * cout * L * 4)
        out3 = pl.pallas_call(
            hra_outlayer_fused_kernel,
            out_shape=jax.ShapeDtypeStruct((b, cout, L), jnp.float32),
            grid=(nL, b),                         # L outer -> W_fc tile reused over batch
            in_specs=[
                pl.BlockSpec(memory_space=pltpu.MemorySpace.SMEM),        # V (b, d)
                pl.BlockSpec((1, c, TL), lambda li, bi: (bi, 0, li)),     # h_sc tile
                pl.BlockSpec((d, c, TL), lambda li, bi: (0, 0, li)),      # W_fc tile (bf16)
                pl.BlockSpec(w1a.shape, lambda li, bi: (0, 0)),           # w1a (resident)
                pl.BlockSpec(w1b.shape, lambda li, bi: (0, 0)),           # w1b (resident)
                pl.BlockSpec(b1.shape, lambda li, bi: (0, 0)),            # b1
                pl.BlockSpec(w2.shape, lambda li, bi: (0, 0)),            # w2
                pl.BlockSpec(b2.shape, lambda li, bi: (0, 0)),            # b2
            ],
            out_specs=pl.BlockSpec((1, cout, TL), lambda li, bi: (bi, 0, li)),
            compiler_params=pltpu.CompilerParams(
                dimension_semantics=sem, vmem_limit_bytes=_VMEM_LIMIT),
            cost_estimate=cost,
        )(v, x3, wfc_r, w1a, w1b, b1, w2, b2)
    else:
        w1 = params["w1"]
        cin = w1.shape[1]
        bytes_per_lane = 4 * cin + 4 * cout
        TL, nL = _choose_l_tile(L, bytes_per_lane)
        cost = pl.CostEstimate(
            flops=b * L * (2 * cin * c + 2 * c * cout),
            transcendentals=0,
            bytes_accessed=b * cin * L * 4 + b * cout * L * 4)
        out3 = pl.pallas_call(
            hra_outlayer_kernel,
            out_shape=jax.ShapeDtypeStruct((b, cout, L), jnp.float32),
            grid=(nL, b),
            in_specs=[
                pl.BlockSpec((1, cin, TL), lambda li, bi: (bi, 0, li)),
                pl.BlockSpec(w1.shape, lambda li, bi: (0, 0)),
                pl.BlockSpec(b1.shape, lambda li, bi: (0, 0)),
                pl.BlockSpec(w2.shape, lambda li, bi: (0, 0)),
                pl.BlockSpec(b2.shape, lambda li, bi: (0, 0)),
            ],
            out_specs=pl.BlockSpec((1, cout, TL), lambda li, bi: (bi, 0, li)),
            compiler_params=pltpu.CompilerParams(
                dimension_semantics=sem, vmem_limit_bytes=_VMEM_LIMIT),
            cost_estimate=cost,
        )(x3, w1, b1, w2, b2)

    return out3.reshape(b, cout, s, n, t)


# ----------------------------------------------------------------------------
# Deterministic parameter construction (xavier-normal style)
# ----------------------------------------------------------------------------
def xavier_normal(key, shape):
    fan_out, fan_in = shape[0], shape[1]
    std = (2.0 / (fan_in + fan_out)) ** 0.5
    return std * jax.random.normal(key, shape, dtype=jnp.float32)


def make_params(key, num_nodes, num_source, n_pred, out_dim, channels, hra_bool=True):
    memo_num = 8
    memo_dim = channels
    flat_hidden = num_source * num_nodes * channels
    cin = channels + memo_dim if hra_bool else channels
    cout = n_pred * out_dim
    keys = jax.random.split(key, 7)
    params = {
        # Conv3d(1x1x1) weights stored channels-first as (out, in); biases (out, 1).
        "w1": xavier_normal(keys[3], (channels, cin)),
        "b1": 0.01 * jax.random.normal(keys[4], (channels, 1), dtype=jnp.float32),
        "w2": xavier_normal(keys[5], (cout, channels)),
        "b2": 0.01 * jax.random.normal(keys[6], (cout, 1), dtype=jnp.float32),
    }
    if hra_bool:
        # W_q is stored PRE-TRANSPOSED (memo_dim, F) and zero-padded to a
        # 128-multiple F, in bf16 -> no per-call transpose/pad copies; streamed
        # weights stay bf16 (halves HBM bytes on this memory-bound op).
        fp = _round_up(flat_hidden, 128)
        w_q = xavier_normal(keys[1], (flat_hidden, memo_dim))   # PyTorch layout
        w_qt = jnp.zeros((memo_dim, fp), jnp.float32).at[:, :flat_hidden].set(w_q.T)
        params.update({
            "memory": xavier_normal(keys[0], (memo_num, memo_dim)),
            "W_qT": w_qt.astype(jnp.bfloat16),
            "W_fc": xavier_normal(keys[2], (memo_dim, flat_hidden)).astype(jnp.bfloat16),
            "flat_hidden": flat_hidden,
        })
    return params


# ----------------------------------------------------------------------------
# Pure-JAX reference (mirrors the PyTorch forward) for the correctness check
# ----------------------------------------------------------------------------
def hra_reference(h_sc, params, hra_bool=True):
    b, c, s, n, t = h_sc.shape
    L = s * n * t
    x3 = h_sc.reshape(b, c, L)
    if hra_bool:
        F = params["flat_hidden"]
        wq = params["W_qT"][:, :F].astype(jnp.float32).T        # (F, d)
        wfc = params["W_fc"].astype(jnp.float32)
        mem = params["memory"]
        q = h_sc.reshape(b, -1) @ wq
        att = jax.nn.softmax(q @ mem.T, axis=1)
        v = att @ mem
        h_me = (v @ wfc).reshape(b, c, L)
        x3 = jnp.concatenate([x3, h_me], axis=1)
    x = jnp.maximum(x3, 0.0)
    h1 = jnp.einsum("bcl,dc->bdl", x, params["w1"]) + params["b1"][None]
    h1 = jnp.maximum(h1, 0.0)
    out = jnp.einsum("bcl,dc->bdl", h1, params["w2"]) + params["b2"][None]
    return out.reshape(b, out.shape[1], s, n, t)


if __name__ == "__main__":
    b = 2
    channels = 8
    num_source = 4
    num_nodes = 4
    t = 1            # module's flat_hidden = num_source*num_nodes*channels implies t == 1
    n_pred = 3
    out_dim = 2

    key = jax.random.PRNGKey(0)
    k_p1, k_p2, k_x = jax.random.split(key, 3)
    h_sc = jax.random.normal(
        k_x, (b, channels, num_source, num_nodes, t), dtype=jnp.float32)

    # Tolerance 2e-3: the q = h @ W_q step now runs bf16 x bf16 on the MXU
    # (h rounded to bf16), on top of the already-accepted bf16 weight storage.
    # hra_bool = True path (memory augmentation + out-layer)
    params = make_params(k_p1, num_nodes, num_source, n_pred, out_dim, channels,
                         hra_bool=True)
    out = jax.block_until_ready(hra_forward(h_sc, params, hra_bool=True))
    ref = jax.block_until_ready(hra_reference(h_sc, params, hra_bool=True))
    assert out.shape == (b, n_pred * out_dim, num_source, num_nodes, t), out.shape
    assert jnp.allclose(out, ref, atol=2e-3, rtol=2e-3), \
        float(jnp.max(jnp.abs(out - ref)))

    # hra_bool = False path (plain out-layer)
    params_nf = make_params(k_p2, num_nodes, num_source, n_pred, out_dim, channels,
                            hra_bool=False)
    out_nf = jax.block_until_ready(hra_forward(h_sc, params_nf, hra_bool=False))
    ref_nf = jax.block_until_ready(hra_reference(h_sc, params_nf, hra_bool=False))
    assert out_nf.shape == out.shape, out_nf.shape
    assert jnp.allclose(out_nf, ref_nf, atol=2e-3, rtol=2e-3), \
        float(jnp.max(jnp.abs(out_nf - ref_nf)))

    print("KERNEL_OK")
</pallas_src>

<mosaic_0001>
module attributes {stable_mosaic.version = 11 : i64} {
  func.func @hra_attention_v_kernel(%arg0: i32, %arg1: memref<2x128xf32, #tpu.memory_space<vmem>>, %arg2: memref<8x128xbf16, #tpu.memory_space<vmem>>, %arg3: memref<8x8xf32, #tpu.memory_space<vmem>>, %arg4: memref<2x8xf32, #tpu.memory_space<vmem>>, %arg5: memref<2x8xf32, #tpu.memory_space<vmem>>) attributes {dimension_semantics = [#tpu.dimension_semantics<arbitrary>], iteration_bounds = array<i64: 1>, scalar_prefetch = 0 : i64, scratch_operands = 1 : i64, tpu.core_type = #tpu.core_type<tc>, window_params = [{transform_indices = @transform_0, window_bounds = array<i64: 2, 128>}, {transform_indices = @transform_1, window_bounds = array<i64: 8, 128>}, {pipeline_mode = #tpu.pipeline_mode<synchronous>, transform_indices = @transform_2, window_bounds = array<i64: 8, 8>}, {pipeline_mode = #tpu.pipeline_mode<synchronous>, transform_indices = @transform_3, window_bounds = array<i64: 2, 8>}]} {
    %c0_i32 = arith.constant 0 : i32
    %0 = arith.cmpi eq, %arg0, %c0_i32 : i32
    %1 = arith.extui %0 : i1 to i32
    %c0_i32_0 = arith.constant 0 : i32
    %2 = arith.cmpi ne, %1, %c0_i32_0 : i32
    scf.if %2 {
      %cst_10 = arith.constant 0.000000e+00 : f32
      %13 = vector.broadcast %cst_10 : f32 to vector<2x8xf32>
      %c0_11 = arith.constant 0 : index
      %c0_12 = arith.constant 0 : index
      %14 = vector.load %arg5[%c0_11, %c0_12] : memref<2x8xf32, #tpu.memory_space<vmem>>, vector<2x8xf32>
      tpu.vector_store %arg5[%c0_11, %c0_12], %13 {strides = array<i32>} : memref<2x8xf32, #tpu.memory_space<vmem>>, vector<2x8xf32>,
    } else {
    }
    %c0 = arith.constant 0 : index
    %c0_1 = arith.constant 0 : index
    %3 = vector.load %arg1[%c0, %c0_1] : memref<2x128xf32, #tpu.memory_space<vmem>>, vector<2x128xf32>
    %4 = arith.truncf %3 : vector<2x128xf32> to vector<2x128xbf16>
    %c0_2 = arith.constant 0 : index
    %c0_3 = arith.constant 0 : index
    %5 = vector.load %arg2[%c0_2, %c0_3] : memref<8x128xbf16, #tpu.memory_space<vmem>>, vector<8x128xbf16>
    %c0_4 = arith.constant 0 : index
    %c0_5 = arith.constant 0 : index
    %6 = vector.load %arg5[%c0_4, %c0_5] : memref<2x8xf32, #tpu.memory_space<vmem>>, vector<2x8xf32>
    %cst = arith.constant dense<0.000000e+00> : vector<2x8xf32>
    %7 = tpu.matmul %4, %5, %cst {dimension_numbers = #tpu.dot_dimension_numbers<[1], [1], [0], [0], [0, 0, 1, 0], [], []>} : vector<2x128xbf16>, vector<8x128xbf16>, vector<2x8xf32> -> vector<2x8xf32>
    %8 = arith.addf %6, %7 : vector<2x8xf32>
    %c0_6 = arith.constant 0 : index
    %c0_7 = arith.constant 0 : index
    %9 = vector.load %arg5[%c0_6, %c0_7] : memref<2x8xf32, #tpu.memory_space<vmem>>, vector<2x8xf32>
    tpu.vector_store %arg5[%c0_6, %c0_7], %8 {strides = array<i32>} : memref<2x8xf32, #tpu.memory_space<vmem>>, vector<2x8xf32>,
    %c0_i32_8 = arith.constant 0 : i32
    %10 = arith.cmpi eq, %arg0, %c0_i32_8 : i32
    %11 = arith.extui %10 : i1 to i32
    %c0_i32_9 = arith.constant 0 : i32
    %12 = arith.cmpi ne, %11, %c0_i32_9 : i32
    scf.if %12 {
      %c0_10 = arith.constant 0 : index
      %c0_11 = arith.constant 0 : index
      %13 = vector.load %arg3[%c0_10, %c0_11] : memref<8x8xf32, #tpu.memory_space<vmem>>, vector<8x8xf32>
      %c0_12 = arith.constant 0 : index
      %c0_13 = arith.constant 0 : index
      %14 = vector.load %arg5[%c0_12, %c0_13] : memref<2x8xf32, #tpu.memory_space<vmem>>, vector<2x8xf32>
      %cst_14 = arith.constant dense<0.000000e+00> : vector<2x8xf32>
      %15 = tpu.matmul %14, %13, %cst_14 {dimension_numbers = #tpu.dot_dimension_numbers<[1], [1], [0], [0], [0, 0, 1, 0], [], []>} : vector<2x8xf32>, vector<8x8xf32>, vector<2x8xf32> -> vector<2x8xf32>
      %cst_15 = arith.constant dense<0xFF800000> : vector<2xf32>
      %16 = vector.multi_reduction <maximumf>, %15, %cst_15 [1] : vector<2x8xf32> to vector<2xf32>
      %17 = vector.shape_cast %16 : vector<2xf32> to vector<2x1xf32>
      %18 = vector.broadcast %17 : vector<2x1xf32> to vector<2x8xf32>
      %19 = arith.subf %15, %18 : vector<2x8xf32>
      %20 = math.exp %19 : vector<2x8xf32>
      %cst_16 = arith.constant dense<0.000000e+00> : vector<2xf32>
      %21 = vector.multi_reduction <add>, %20, %cst_16 [1] : vector<2x8xf32> to vector<2xf32>
      %22 = vector.shape_cast %21 : vector<2xf32> to vector<2x1xf32>
      %23 = tpu.reciprocal %22 : vector<2x1xf32> -> vector<2x1xf32>
      %24 = vector.broadcast %23 : vector<2x1xf32> to vector<2x8xf32>
      %25 = arith.mulf %20, %24 : vector<2x8xf32>
      %cst_17 = arith.constant dense<0.000000e+00> : vector<2x8xf32>
      %26 = tpu.matmul %25, %13, %cst_17 {dimension_numbers = #tpu.dot_dimension_numbers<[1], [0], [0], [1], [0, 0, 1, 1], [], []>} : vector<2x8xf32>, vector<8x8xf32>, vector<2x8xf32> -> vector<2x8xf32>
      %c0_18 = arith.constant 0 : index
      %c0_19 = arith.constant 0 : index
      %27 = vector.load %arg4[%c0_18, %c0_19] : memref<2x8xf32, #tpu.memory_space<vmem>>, vector<2x8xf32>
      tpu.vector_store %arg4[%c0_18, %c0_19], %26 {strides = array<i32>} : memref<2x8xf32, #tpu.memory_space<vmem>>, vector<2x8xf32>,
    } else {
    }
    return
  }
  func.func @transform_0(%arg0: i32) -> (i32, i32) {
    %c0_i32 = arith.constant 0 : i32
    %c0_i32_0 = arith.constant 0 : i32
    return %c0_i32, %arg0 : i32, i32
  }
  func.func @transform_1(%arg0: i32) -> (i32, i32) {
    %c0_i32 = arith.constant 0 : i32
    %c0_i32_0 = arith.constant 0 : i32
    return %c0_i32, %arg0 : i32, i32
  }
  func.func @transform_2(%arg0: i32) -> (i32, i32) {
    %c0_i32 = arith.constant 0 : i32
    %c0_i32_0 = arith.constant 0 : i32
    %c0_i32_1 = arith.constant 0 : i32
    return %c0_i32, %c0_i32_0 : i32, i32
  }
  func.func @transform_3(%arg0: i32) -> (i32, i32) {
    %c0_i32 = arith.constant 0 : i32
    %c0_i32_0 = arith.constant 0 : i32
    %c0_i32_1 = arith.constant 0 : i32
    return %c0_i32, %c0_i32_0 : i32, i32
  }
}

</mosaic_0001>

<bundles_post_ra>
// kernel: tpu_custom_call.1
= control target key start
LH: loop header
LB: loop body
LE: loop exit
PB: predicated region body
PF: predicated region fallthrough
CT: control target
= control target key end

     0   :  { %8 = vsyncpa [#allocation4], 0  ;;  %s501_s0 = inlined_call_operand.hbm [shape: f32[2,128], index: 0, kind: input, shape index: {}]   ;;  %s502_s1 = inlined_call_operand.hbm [shape: bf16[8,128], index: 1, kind: input, shape index: {}]   ;;  %s503_s2 = inlined_call_operand.hbm [shape: f32[8,8], index: 2, kind: input, shape index: {}]   ;;  %s504_s3 = inlined_call_operand.hbm [shape: f32[2,8], index: 3, kind: output, shape index: {}]  }
   0x1   :  { %9 = vsyncpa [#allocation7], 0 }
   0x2   :  { %10 = vsyncpa [#allocation5], 0  ;;  %s416_s12 = smov [#allocation6]   ;;  %s417_s14 = smov [#allocation3]  }
   0x3   :  { %s27_s13 = sshll.u32 %s416_s12, 4  ;;  %s17_s15 = sshll.u32 %s417_s14, 4  ;;  %s28_s13 = int_to_ptr.vmem [resolvable:$true] %s27_s13  ;;  %s18_s15 = int_to_ptr.vmem [resolvable:$true] %s17_s15 }
   0x4   :  { %s322_s18 = scalar_lea.hbm %s502_s1, 64 }
   0x5   :  { %p323_p0 = scmp.ne.s32.totalorder %s502_s1, %s322_s18  ;;  %p326_p1 = scmp.lt.u32.totalorder %s322_s18, %s502_s1 }
   0x7   :  { %p328_p2 = pnand %p326_p1, %p323_p0 }
   0x9   :  { %331 = shalt.err (!%p328_p2)
}
   0xa   :  { %s332_s23 = scalar_lea.vmem %s28_s13, 64  ;;  %p337_p4 = scmp.lt.s32.totalorder %s28_s13, %s28_s13 }
   0xb   :  { %p333_p3 = scmp.ne.s32.totalorder %s28_s13, %s332_s23  ;;  %p338_p5 = scmp.lt.s32.totalorder %s332_s23, %s332_s23 }
   0xd   :  { %p339_p6 = por %p338_p5, %p337_p4 }
   0xf   :  { %p340_p7 = pnand %p339_p6, %p333_p3 }
  0x11   :  { %343 = shalt.err (!%p340_p7)
}
  0x12   :  { %30 = dma.hbm_to_vmem [thread:$0]  %s502_s1, 64, %s28_s13, [#allocation7]  }
  0x13   :  { %s344_s28 = scalar_lea.hbm %s501_s0, 32 }
  0x14   :  { %p345_p8 = scmp.ne.s32.totalorder %s501_s0, %s344_s28  ;;  %p348_p9 = scmp.lt.u32.totalorder %s344_s28, %s501_s0 }
  0x16   :  { %p350_p10 = pnand %p348_p9, %p345_p8 }
  0x18   :  { %353 = shalt.err (!%p350_p10)
}
  0x19   :  { %s354_s6 = scalar_lea.vmem %s18_s15, 32  ;;  %p359_p12 = scmp.lt.s32.totalorder %s18_s15, %s18_s15 }
  0x1a   :  { %p355_p11 = scmp.ne.s32.totalorder %s18_s15, %s354_s6  ;;  %p360_p13 = scmp.lt.s32.totalorder %s354_s6, %s354_s6 }
  0x1c   :  { %p361_p0 = por %p360_p13, %p359_p12 }
  0x1e   :  { %p362_p1 = pnand %p361_p0, %p355_p11 }
  0x20   :  { %365 = shalt.err (!%p362_p1)
}
  0x21   :  { %20 = dma.hbm_to_vmem [thread:$0]  %s501_s0, 32, %s18_s15, [#allocation4]  }
  0x22   :  { %s418_s8 = smov [#allocation8]   ;;  %s366_s12 = scalar_lea.hbm %s503_s2, 128 }
  0x23   :  { %s37_s9 = sshll.u32 %s418_s8, 4  ;;  %p367_p2 = scmp.ne.s32.totalorder %s503_s2, %s366_s12  ;;  %s38_s9 = int_to_ptr.vmem [resolvable:$true] %s37_s9 }
  0x24   :  { %p370_p3 = scmp.lt.u32.totalorder %s366_s12, %s503_s2 }
  0x26   :  { %p372_p4 = pnand %p370_p3, %p367_p2 }
  0x28   :  { %375 = shalt.err (!%p372_p4)
}
  0x29   :  { %s376_s18 = scalar_lea.vmem %s38_s9, 128  ;;  %p381_p6 = scmp.lt.s32.totalorder %s38_s9, %s38_s9 }
  0x2a   :  { %p377_p5 = scmp.ne.s32.totalorder %s38_s9, %s376_s18  ;;  %p382_p7 = scmp.lt.s32.totalorder %s376_s18, %s376_s18 }
  0x2c   :  { %p383_p8 = por %p382_p7, %p381_p6 }
  0x2e   :  { %p384_p9 = pnand %p383_p8, %p377_p5 }
  0x30   :  { %387 = shalt.err (!%p384_p9)
}
  0x31   :  { %40 = dma.hbm_to_vmem [thread:$0]  %s503_s2, 128, %s38_s9, [#allocation7]  }
  0x32   :  { %410 = dma.done.wait [#allocation4], 32  }
  0x33   :  { %411 = vsyncadd [#allocation4], 4294967264 }
  0x34   :  { %412 = dma.done.wait [#allocation7], 192  }
  0x35   :  { %413 = vsyncadd [#allocation7], 4294967104  ;;  %vm55_vm0 = vcmask 58368   ;;  %v419_v0 = vmov 0.0   ;;  %vm420_vm1 = vmmov 0   ;;  %v107_v4 = vld [vmem:[#allocation8] sm:$0xff] }
  0x36   :  { %296 = vmatprep.subr.bf16.mxu0 %v419_v0  ;;  %298 = vmatprep.mubr.msk.bf16.mxu0 %vm420_vm1, %v419_v0  ;;  %56 = vst.msk [vmem:[#allocation2] sm:$0x3] %vm55_vm0, %v419_v0  ;;  %v59_v1 = vld [vmem:[#allocation6] sm:$0xf]  ;;  %v57_v2 = vld [vmem:[#allocation3] sm:$0x3] }
  0x37   :  { %302 = vmatprep.subr.mxu1 %v419_v0  ;;  %304 = vmatprep.mubr.msk.f32.mxu1 %vm420_vm1, %v419_v0  ;;  %v58_v3 = vpack.c.bf16 %v57_v2, %v57_v2  ;;  %vm109_vm2 = vcmask 64512   ;;  %s421_s2 = smov [#allocation9]  }
  0x38   :  { %297 = vmatpush3.bf16.xpose.msra.mxu0 %v59_v1  ;;  %303 = vmatpush3.xpose.msk.msra.mxu1 %vm109_vm2, %v107_v4  ;;  %s277_s19 = sshll.u32 %s421_s2, 4  ;;  %s278_s19 = int_to_ptr.vmem [resolvable:$true] %s277_s19 }
  0x39   :  { %307 = vmatprep.subr.mxu1 %v419_v0  ;;  %s388_s20 = scalar_lea.vmem %s278_s19, 32  ;;  %p393_p11 = scmp.lt.s32.totalorder %s278_s19, %s278_s19 }
  0x3a   :  { %p389_p10 = scmp.ne.s32.totalorder %s278_s19, %s388_s20  ;;  %p394_p12 = scmp.lt.s32.totalorder %s388_s20, %s388_s20 }
  0x3c   :  { %p395_p13 = por %p394_p12, %p393_p11 }
  0x3d   :  { %v60_v5 = vld [vmem:[#allocation2] sm:$0x3] }
  0x3e   :  { %p396_p0 = pnand %p395_p13, %p389_p10 }
  0x3f   :  { %299 = vmatmul.mubr.bf16.vlgmr.msra.gmra.mrb[0].mxu0 %v58_v3 }
 0x112   :  { %v95_v6 = vpop.f32.mrb[0].mxu0 }
 0x113   :  { %v101_v7 = vadd.f32 %v95_v6, %v60_v5  ;;  %v300_v8 = vpop.f32.mrb[1].mxu0 }
 0x114   :  { %v98_v9 = vpop.f32.mrb[2].mxu0 }
 0x115   :  { %103 = vst.msk [vmem:[#allocation2] sm:$0x3] %vm55_vm0, %v101_v7  ;;  %v301_v10 = vpop.f32.mrb[3].mxu0 }
 0x11c   :  { %v108_v11 = vld [vmem:[#allocation2] sm:$0x3] }
 0x11d   :  { %305 = vmatmul.mubr.msk.f32.vlgmr.msra.gmra.mrb[0].mxu1 %vm109_vm2, %v108_v11 }
 0x11e   :  { %308 = vmatpush3.msra.mxu1 %v107_v4  ;;  %309 = vmatprep.mubr.msk.f32.mxu1 %vm420_vm1, %v419_v0 }
 0x1f0   :  { %v182_v12 = vpop.f32.mrb[0].mxu1 }
 0x1f1   :  { %v306_v13 = vpop.f32.mrb[1].mxu1  ;;  %v186_v14 = vsel %vm55_vm0, %v182_v12, -inf }
 0x1f2   :  { %187 = vmax.xlane.f32.xlu0 %v186_v14 }
 0x27f   :  { %v188_v15 = vpop.xlane.xlu0 %187 }
 0x280   :  { %v189_v16 = vsub.f32 %v182_v12, %v188_v15 }
 0x282   :  { %v190_v17 = vmul.f32 1.442695, %v189_v16 }
 0x284   :  { %318 = vpow2.f32 %v190_v17 }
 0x28e   :  { %v319_v18 = vpop.eup %318 }
 0x28f   :  { %v192_v19 = vsel %vm55_vm0, %v319_v18, 0.0 }
 0x290   :  { %193 = vadd.xlane.f32.xlu0 %v192_v19 }
 0x31d   :  { %v194_v20 = vpop.xlane.xlu0 %193 }
 0x31e   :  { %320 = vrcp.f32 %v194_v20 }
 0x328   :  { %v321_v21 = vpop.eup %320 }
 0x329   :  { %v196_v22 = vmul.f32 %v321_v21, %v319_v18 }
 0x32b   :  { %310 = vmatmul.mubr.msk.f32.vlgmr.msra.gmra.mrb[2].mxu1 %vm109_vm2, %v196_v22 }
 0x3fe   :  { %v266_v23 = vpop.f32.mrb[2].mxu1 }
 0x3ff   :  { %270 = vst.msk [vmem:[#allocation9] sm:$0x3] %vm55_vm0, %v266_v23  ;;  %v311_v24 = vpop.f32.mrb[3].mxu1 }
 0x400   :  { %399 = shalt.err (!%p396_p0)
}
 0x401   :  { %s400_s23 = scalar_lea.hbm %s504_s3, 32 }
 0x402   :  { %p401_p1 = scmp.ne.s32.totalorder %s504_s3, %s400_s23  ;;  %p404_p2 = scmp.lt.u32.totalorder %s400_s23, %s504_s3 }
 0x404   :  { %p406_p3 = pnand %p404_p2, %p401_p1 }
 0x406   :  { %409 = shalt.err (!%p406_p3)
}
 0x407   :  { %280 = dma.vmem_to_hbm [thread:$0]  %s278_s19, 32, %s504_s3, [#allocation5]  }
 0x408   :  { %414 = dma.done.wait [#allocation5], 32  }
 0x409   :  { %415 = vsyncadd [#allocation5], 4294967264 }
 0x40a   :  { %284 = vsyncpa [#allocation4], 1 }
 0x40b   :  { %285 = vsyncpa [#allocation7], 1 }
 0x40c   :  { %286 = vsyncpa [#allocation5], 1 }

</bundles_post_ra>
